<compile_context>
chip_gen: v7x
topology: tpu7x:2x2x1
jax: 0.10.0
libtpu: 0.0.40
codegen_flags: <defaults>
</compile_context>

<pallas_src>
import jax
import jax.numpy as jnp
from jax.experimental import pallas as pl
from jax.experimental.pallas import tpu as pltpu

_LANES = 1024          # lane-dense last dim (multiple of 128)
_MAX_TILE_ROWS = 512   # 512 x 1024 x 4B = 2 MiB per f32 tile; 2x-buffered
                       # in + out stays well inside scoped VMEM on all gens.


def _identity_kernel(x_ref, o_ref):
    # Straight tile copy. With input/output aliasing this is effectively a
    # no-op on the aliased HBM buffer.
    o_ref[...] = x_ref[...]


def _identity_2d(x2d, tile_rows):
    rows, lanes = x2d.shape
    return pl.pallas_call(
        _identity_kernel,
        out_shape=jax.ShapeDtypeStruct((rows, lanes), x2d.dtype),
        grid=(rows // tile_rows,),
        in_specs=[pl.BlockSpec((tile_rows, lanes), lambda i: (i, 0))],
        out_specs=pl.BlockSpec((tile_rows, lanes), lambda i: (i, 0)),
        # Output aliases the input buffer: no extra HBM allocation, and the
        # copy can be elided by buffer assignment.
        input_output_aliases={0: 0},
        compiler_params=pltpu.CompilerParams(
            dimension_semantics=("parallel",),
        ),
    )(x2d)


def _forward_impl(x):
    orig_shape = x.shape
    n = x.size
    flat = x.reshape(-1)

    if n <= _MAX_TILE_ROWS * _LANES:
        # Small input: one lane-dense full-array block (block == full array
        # dims, so no (8,128) divisibility requirement).
        n_pad = pl.cdiv(n, _LANES) * _LANES
        rows = n_pad // _LANES
        tile_rows = rows
    else:
        # Large input: 512-row tiles; pad so the grid divides evenly.
        blk = _MAX_TILE_ROWS * _LANES
        n_pad = pl.cdiv(n, blk) * blk
        rows = n_pad // _LANES
        tile_rows = _MAX_TILE_ROWS

    if n_pad != n:
        flat = jnp.pad(flat, (0, n_pad - n))

    x2d = flat.reshape(rows, _LANES)
    out2d = _identity_2d(x2d, tile_rows)

    out = out2d.reshape(-1)
    if n_pad != n:
        out = out[:n]          # strip the pad before restoring the shape
    return out.reshape(orig_shape)


_forward_jit = jax.jit(_forward_impl)


def identity_loss_forward(x, y=None):
    """Pallas equivalent of identity_loss.forward(x, y) == x (`y` is ignored)."""
    del y  # matches the PyTorch module: labels are never touched
    return _forward_jit(x)


if __name__ == "__main__":
    key = jax.random.PRNGKey(0)
    kx, ky, kz = jax.random.split(key, 3)

    # Small NCHW input consistent with a typical advertorch image input.
    x = jax.random.normal(kx, (2, 4, 16, 16), dtype=jnp.float32)
    # `y` (labels) is ignored by the module; provide one anyway for parity.
    y = jax.random.randint(ky, (2,), 0, 10)

    out = jax.block_until_ready(identity_loss_forward(x, y))
    assert out.shape == x.shape and out.dtype == x.dtype
    assert bool(jnp.all(out == x))

    # Also exercise the padding path with an odd-sized input.
    x_odd = jax.random.normal(kz, (3, 5, 7), dtype=jnp.float32)
    out_odd = jax.block_until_ready(identity_loss_forward(x_odd, None))
    assert out_odd.shape == x_odd.shape and out_odd.dtype == x_odd.dtype
    assert bool(jnp.all(out_odd == x_odd))

    print("KERNEL_OK")
</pallas_src>

<mosaic_0001>
module attributes {stable_mosaic.version = 11 : i64} {
  func.func @_identity_kernel(%arg0: i32, %arg1: memref<2x1024xf32, #tpu.memory_space<vmem>>, %arg2: memref<2x1024xf32, #tpu.memory_space<vmem>>) attributes {dimension_semantics = [#tpu.dimension_semantics<parallel>], iteration_bounds = array<i64: 1>, scalar_prefetch = 0 : i64, scratch_operands = 0 : i64, tpu.core_type = #tpu.core_type<tc>, window_params = [{transform_indices = @transform_0, window_bounds = array<i64: 2, 1024>}, {transform_indices = @transform_1, window_bounds = array<i64: 2, 1024>}]} {
    %c0 = arith.constant 0 : index
    %c0_0 = arith.constant 0 : index
    %0 = vector.load %arg1[%c0, %c0_0] : memref<2x1024xf32, #tpu.memory_space<vmem>>, vector<2x1024xf32>
    %c0_1 = arith.constant 0 : index
    %c0_2 = arith.constant 0 : index
    %1 = vector.load %arg2[%c0_1, %c0_2] : memref<2x1024xf32, #tpu.memory_space<vmem>>, vector<2x1024xf32>
    tpu.vector_store %arg2[%c0_1, %c0_2], %0 {strides = array<i32>} : memref<2x1024xf32, #tpu.memory_space<vmem>>, vector<2x1024xf32>,
    return
  }
  func.func @transform_0(%arg0: i32) -> (i32, i32) {
    %c0_i32 = arith.constant 0 : i32
    %c0_i32_0 = arith.constant 0 : i32
    return %arg0, %c0_i32 : i32, i32
  }
  func.func @transform_1(%arg0: i32) -> (i32, i32) {
    %c0_i32 = arith.constant 0 : i32
    %c0_i32_0 = arith.constant 0 : i32
    return %arg0, %c0_i32 : i32, i32
  }
}

</mosaic_0001>

<bundles_post_ra>
// kernel: _forward_impl.1
= control target key start
LH: loop header
LB: loop body
LE: loop exit
PB: predicated region body
PF: predicated region fallthrough
CT: control target
= control target key end

     0   :  { %s38_s0 = inlined_call_operand.vmem [shape: f32[2,1024], index: 0, kind: input, shape index: {}, may-alias: {0,1}]   ;;  %s39_s1 = inlined_call_operand.vmem [shape: f32[2,1024], index: 1, kind: output, shape index: {}, may-alias: {0,1}]  }
   0x1   :  { %v8_v0 = vld [vmem:[%s38_s0] sm:$0xff]  ;;  %v9_v1 = vld [vmem:[%s38_s0 + $0x8] sm:$0xff] }
   0x2   :  { %10 = vst [vmem:[%s39_s1] sm:$0xff] %v8_v0  ;;  %11 = vst [vmem:[%s39_s1 + $0x8] sm:$0xff] %v9_v1 }

</bundles_post_ra>
